<compile_context>
chip_gen: v5e
topology: v5e:2x2
jax: 0.10.0
libtpu: 0.0.40
codegen_flags: <defaults>
</compile_context>

<pallas_src>
import jax
import jax.numpy as jnp
from jax.experimental import pallas as pl
from jax.experimental.pallas import tpu as pltpu

_H = 10  # hidden width

# Packed-parameter column layout inside the single (16, 128) constant block:
#   cols 0:2  -> W1 (10,2)      col 2  -> b1 (10,1)
#   cols 3:13 -> W2 (10,10)     col 13 -> b2 (10,1)
#   col 14    -> W3.T (10,1)    [0,15] -> b3 scalar


def mlp_kernel(x_ref, wb_ref, o_ref):
    x = x_ref[...]        # (2, T)   batch on lanes
    wb = wb_ref[...]      # (16, 128) packed params (2 vregs, loaded once)

    # Layer 1 (K=2): two VPU broadcast FMAs + bias, then ReLU.
    h1 = (wb[0:_H, 0:1] * x[0:1, :]
          + wb[0:_H, 1:2] * x[1:2, :]
          + wb[0:_H, 2:3])                       # (10, T)
    h1 = jnp.maximum(h1, 0.0)

    # Layer 2 (10x10): 10 broadcast FMAs on the VPU (exact f32, no MXU).
    h2 = wb[0:_H, 3:4] * h1[0:1, :]
    for k in range(1, _H):
        h2 = h2 + wb[0:_H, 3 + k:4 + k] * h1[k:k + 1, :]
    h2 = h2 + wb[0:_H, 13:14]                    # + b2
    h2 = jnp.maximum(h2, 0.0)

    # Layer 3 (10 -> 1, "layer_5"): 10 scalar-broadcast FMAs + bias.
    out = wb[0:1, 14:15] * h2[0:1, :]
    for k in range(1, _H):
        out = out + wb[k:k + 1, 14:15] * h2[k:k + 1, :]
    out = out + wb[0:1, 15:16]                   # + b3

    o_ref[...] = out.astype(o_ref.dtype)


def _pack_params(params):
    w1, b1, w2, b2, w3, b3 = params
    packed = jnp.zeros((16, 128), jnp.float32)
    packed = packed.at[0:_H, 0:2].set(w1)
    packed = packed.at[0:_H, 2:3].set(b1)
    packed = packed.at[0:_H, 3:13].set(w2)
    packed = packed.at[0:_H, 13:14].set(b2)
    packed = packed.at[0:_H, 14:15].set(w3.T)
    packed = packed.at[0:1, 15:16].set(b3)
    return packed


def circle_model_sigma(x, params, *, batch_tile=None):
    """x: [N, 2] float32. Returns [N, 1] float32 (== CircleModel_Sigma.forward)."""
    N, F = x.shape
    assert F == 2

    if batch_tile is None:
        # Big tiles amortize the ~0.35us/step overhead; cap at 1024 lanes so the
        # (10, T) f32 activations stay inside the 64-vreg file; keep >= 2 grid
        # steps when possible so v7x can split the parallel axis across 2 TCs.
        batch_tile = 1024
        while batch_tile > 128 and pl.cdiv(N, batch_tile) < 2:
            batch_tile //= 2
    assert batch_tile % 128 == 0, "batch_tile must be a multiple of 128 (lane width)"

    n_tiles = pl.cdiv(N, batch_tile)

    # No explicit zero-padding: Pallas handles the ragged last block (the extra
    # lanes carry garbage, are never reduced over, and the final store is
    # masked).  allow_input_fusion lets the (N,2)->(2,N) transpose fuse into
    # the pallas_call input instead of materializing in HBM.
    xt = x.T                               # (2, N), batch on the lane axis
    packed = _pack_params(params)

    out = pl.pallas_call(
        mlp_kernel,
        out_shape=jax.ShapeDtypeStruct((1, N), jnp.float32),
        grid_spec=pltpu.PrefetchScalarGridSpec(
            num_scalar_prefetch=0,
            grid=(n_tiles,),
            in_specs=[
                pl.BlockSpec((2, batch_tile), lambda i: (0, i)),   # lane-dense x tile
                pl.BlockSpec((16, 128), lambda i: (0, 0)),         # packed params, const block
            ],
            out_specs=pl.BlockSpec((1, batch_tile), lambda i: (0, i)),  # lane-dense out
        ),
        compiler_params=pltpu.CompilerParams(
            dimension_semantics=("parallel",),
            allow_input_fusion=[True, False],
        ),
        cost_estimate=pl.CostEstimate(
            flops=300 * N, transcendentals=0, bytes_accessed=12 * N + 8192),
    )(xt, packed)

    return out.T                            # (N, 1)


def init_params(key):
    """nn.Linear-style init: uniform +-1/sqrt(fan_in); W is (out, in), b is (out, 1)."""
    def linear(key, fan_in, fan_out):
        kw, kb = jax.random.split(key)
        bound = 1.0 / jnp.sqrt(fan_in)
        w = jax.random.uniform(kw, (fan_out, fan_in), jnp.float32, -bound, bound)
        b = jax.random.uniform(kb, (fan_out, 1), jnp.float32, -bound, bound)
        return w, b

    k1, k2, k3 = jax.random.split(key, 3)
    w1, b1 = linear(k1, 2, 10)    # layer_1
    w2, b2 = linear(k2, 10, 10)   # layer_2
    w3, b3 = linear(k3, 10, 1)    # layer_5
    return (w1, b1, w2, b2, w3, b3)


def reference_forward(x, params):
    w1, b1, w2, b2, w3, b3 = params
    hi = jax.lax.Precision.HIGHEST
    h1 = jnp.maximum(jnp.dot(x, w1.T, precision=hi) + b1.T, 0.0)
    h2 = jnp.maximum(jnp.dot(h1, w2.T, precision=hi) + b2.T, 0.0)
    return jnp.dot(h2, w3.T, precision=hi) + b3.T


if __name__ == "__main__":
    key = jax.random.PRNGKey(0)
    kp, kx = jax.random.split(key)

    params = init_params(kp)
    # N=1000 -> batch_tile auto-picks 512 -> 2 grid steps (exercises the ragged
    # last block and the v7x-friendly 2-step parallel axis) while staying tiny.
    N = 1000
    x = jax.random.normal(kx, (N, 2), jnp.float32)

    fwd = jax.jit(circle_model_sigma)
    out = jax.block_until_ready(fwd(x, params))

    ref = reference_forward(x, params)
    assert out.shape == (N, 1)
    assert jnp.allclose(out, ref, atol=1e-5, rtol=1e-5), "mismatch vs JAX reference"

    print("KERNEL_OK")
</pallas_src>

<mosaic_0001>
module attributes {stable_mosaic.version = 11 : i64} {
  func.func @mlp_kernel(%arg0: i32, %arg1: memref<2x512xf32, #tpu.memory_space<vmem>>, %arg2: memref<16x128xf32, #tpu.memory_space<vmem>>, %arg3: memref<1x512xf32, #tpu.memory_space<vmem>>) attributes {dimension_semantics = [#tpu.dimension_semantics<parallel>], iteration_bounds = array<i64: 2>, scalar_prefetch = 0 : i64, scratch_operands = 0 : i64, tpu.core_type = #tpu.core_type<tc>, window_params = [{transform_indices = @transform_0, window_bounds = array<i64: 2, 512>}, {pipeline_mode = #tpu.pipeline_mode<synchronous>, transform_indices = @transform_1, window_bounds = array<i64: 16, 128>}, {transform_indices = @transform_2, window_bounds = array<i64: 1, 512>}]} {
    %c0 = arith.constant 0 : index
    %c0_0 = arith.constant 0 : index
    %0 = vector.load %arg1[%c0, %c0_0] : memref<2x512xf32, #tpu.memory_space<vmem>>, vector<2x512xf32>
    %c0_1 = arith.constant 0 : index
    %c0_2 = arith.constant 0 : index
    %1 = vector.load %arg2[%c0_1, %c0_2] : memref<16x128xf32, #tpu.memory_space<vmem>>, vector<16x128xf32>
    %2 = vector.extract_strided_slice %1 {offsets = [0, 0], sizes = [10, 1], strides = [1, 1]} : vector<16x128xf32> to vector<10x1xf32>
    %3 = vector.extract_strided_slice %0 {offsets = [0, 0], sizes = [1, 512], strides = [1, 1]} : vector<2x512xf32> to vector<1x512xf32>
    %4 = vector.broadcast %2 : vector<10x1xf32> to vector<10x512xf32>
    %5 = vector.broadcast %3 : vector<1x512xf32> to vector<10x512xf32>
    %6 = arith.mulf %4, %5 : vector<10x512xf32>
    %7 = vector.extract_strided_slice %1 {offsets = [0, 1], sizes = [10, 1], strides = [1, 1]} : vector<16x128xf32> to vector<10x1xf32>
    %8 = vector.extract_strided_slice %0 {offsets = [1, 0], sizes = [1, 512], strides = [1, 1]} : vector<2x512xf32> to vector<1x512xf32>
    %9 = vector.broadcast %7 : vector<10x1xf32> to vector<10x512xf32>
    %10 = vector.broadcast %8 : vector<1x512xf32> to vector<10x512xf32>
    %11 = arith.mulf %9, %10 : vector<10x512xf32>
    %12 = arith.addf %6, %11 : vector<10x512xf32>
    %13 = vector.extract_strided_slice %1 {offsets = [0, 2], sizes = [10, 1], strides = [1, 1]} : vector<16x128xf32> to vector<10x1xf32>
    %14 = vector.broadcast %13 : vector<10x1xf32> to vector<10x512xf32>
    %15 = arith.addf %12, %14 : vector<10x512xf32>
    %cst = arith.constant 0.000000e+00 : f32
    %16 = vector.broadcast %cst : f32 to vector<10x512xf32>
    %17 = arith.maximumf %15, %16 : vector<10x512xf32>
    %18 = vector.extract_strided_slice %1 {offsets = [0, 3], sizes = [10, 1], strides = [1, 1]} : vector<16x128xf32> to vector<10x1xf32>
    %19 = vector.extract_strided_slice %17 {offsets = [0, 0], sizes = [1, 512], strides = [1, 1]} : vector<10x512xf32> to vector<1x512xf32>
    %20 = vector.broadcast %18 : vector<10x1xf32> to vector<10x512xf32>
    %21 = vector.broadcast %19 : vector<1x512xf32> to vector<10x512xf32>
    %22 = arith.mulf %20, %21 : vector<10x512xf32>
    %23 = vector.extract_strided_slice %1 {offsets = [0, 4], sizes = [10, 1], strides = [1, 1]} : vector<16x128xf32> to vector<10x1xf32>
    %24 = vector.extract_strided_slice %17 {offsets = [1, 0], sizes = [1, 512], strides = [1, 1]} : vector<10x512xf32> to vector<1x512xf32>
    %25 = vector.broadcast %23 : vector<10x1xf32> to vector<10x512xf32>
    %26 = vector.broadcast %24 : vector<1x512xf32> to vector<10x512xf32>
    %27 = arith.mulf %25, %26 : vector<10x512xf32>
    %28 = arith.addf %22, %27 : vector<10x512xf32>
    %29 = vector.extract_strided_slice %1 {offsets = [0, 5], sizes = [10, 1], strides = [1, 1]} : vector<16x128xf32> to vector<10x1xf32>
    %30 = vector.extract_strided_slice %17 {offsets = [2, 0], sizes = [1, 512], strides = [1, 1]} : vector<10x512xf32> to vector<1x512xf32>
    %31 = vector.broadcast %29 : vector<10x1xf32> to vector<10x512xf32>
    %32 = vector.broadcast %30 : vector<1x512xf32> to vector<10x512xf32>
    %33 = arith.mulf %31, %32 : vector<10x512xf32>
    %34 = arith.addf %28, %33 : vector<10x512xf32>
    %35 = vector.extract_strided_slice %1 {offsets = [0, 6], sizes = [10, 1], strides = [1, 1]} : vector<16x128xf32> to vector<10x1xf32>
    %36 = vector.extract_strided_slice %17 {offsets = [3, 0], sizes = [1, 512], strides = [1, 1]} : vector<10x512xf32> to vector<1x512xf32>
    %37 = vector.broadcast %35 : vector<10x1xf32> to vector<10x512xf32>
    %38 = vector.broadcast %36 : vector<1x512xf32> to vector<10x512xf32>
    %39 = arith.mulf %37, %38 : vector<10x512xf32>
    %40 = arith.addf %34, %39 : vector<10x512xf32>
    %41 = vector.extract_strided_slice %1 {offsets = [0, 7], sizes = [10, 1], strides = [1, 1]} : vector<16x128xf32> to vector<10x1xf32>
    %42 = vector.extract_strided_slice %17 {offsets = [4, 0], sizes = [1, 512], strides = [1, 1]} : vector<10x512xf32> to vector<1x512xf32>
    %43 = vector.broadcast %41 : vector<10x1xf32> to vector<10x512xf32>
    %44 = vector.broadcast %42 : vector<1x512xf32> to vector<10x512xf32>
    %45 = arith.mulf %43, %44 : vector<10x512xf32>
    %46 = arith.addf %40, %45 : vector<10x512xf32>
    %47 = vector.extract_strided_slice %1 {offsets = [0, 8], sizes = [10, 1], strides = [1, 1]} : vector<16x128xf32> to vector<10x1xf32>
    %48 = vector.extract_strided_slice %17 {offsets = [5, 0], sizes = [1, 512], strides = [1, 1]} : vector<10x512xf32> to vector<1x512xf32>
    %49 = vector.broadcast %47 : vector<10x1xf32> to vector<10x512xf32>
    %50 = vector.broadcast %48 : vector<1x512xf32> to vector<10x512xf32>
    %51 = arith.mulf %49, %50 : vector<10x512xf32>
    %52 = arith.addf %46, %51 : vector<10x512xf32>
    %53 = vector.extract_strided_slice %1 {offsets = [0, 9], sizes = [10, 1], strides = [1, 1]} : vector<16x128xf32> to vector<10x1xf32>
    %54 = vector.extract_strided_slice %17 {offsets = [6, 0], sizes = [1, 512], strides = [1, 1]} : vector<10x512xf32> to vector<1x512xf32>
    %55 = vector.broadcast %53 : vector<10x1xf32> to vector<10x512xf32>
    %56 = vector.broadcast %54 : vector<1x512xf32> to vector<10x512xf32>
    %57 = arith.mulf %55, %56 : vector<10x512xf32>
    %58 = arith.addf %52, %57 : vector<10x512xf32>
    %59 = vector.extract_strided_slice %1 {offsets = [0, 10], sizes = [10, 1], strides = [1, 1]} : vector<16x128xf32> to vector<10x1xf32>
    %60 = vector.extract_strided_slice %17 {offsets = [7, 0], sizes = [1, 512], strides = [1, 1]} : vector<10x512xf32> to vector<1x512xf32>
    %61 = vector.broadcast %59 : vector<10x1xf32> to vector<10x512xf32>
    %62 = vector.broadcast %60 : vector<1x512xf32> to vector<10x512xf32>
    %63 = arith.mulf %61, %62 : vector<10x512xf32>
    %64 = arith.addf %58, %63 : vector<10x512xf32>
    %65 = vector.extract_strided_slice %1 {offsets = [0, 11], sizes = [10, 1], strides = [1, 1]} : vector<16x128xf32> to vector<10x1xf32>
    %66 = vector.extract_strided_slice %17 {offsets = [8, 0], sizes = [1, 512], strides = [1, 1]} : vector<10x512xf32> to vector<1x512xf32>
    %67 = vector.broadcast %65 : vector<10x1xf32> to vector<10x512xf32>
    %68 = vector.broadcast %66 : vector<1x512xf32> to vector<10x512xf32>
    %69 = arith.mulf %67, %68 : vector<10x512xf32>
    %70 = arith.addf %64, %69 : vector<10x512xf32>
    %71 = vector.extract_strided_slice %1 {offsets = [0, 12], sizes = [10, 1], strides = [1, 1]} : vector<16x128xf32> to vector<10x1xf32>
    %72 = vector.extract_strided_slice %17 {offsets = [9, 0], sizes = [1, 512], strides = [1, 1]} : vector<10x512xf32> to vector<1x512xf32>
    %73 = vector.broadcast %71 : vector<10x1xf32> to vector<10x512xf32>
    %74 = vector.broadcast %72 : vector<1x512xf32> to vector<10x512xf32>
    %75 = arith.mulf %73, %74 : vector<10x512xf32>
    %76 = arith.addf %70, %75 : vector<10x512xf32>
    %77 = vector.extract_strided_slice %1 {offsets = [0, 13], sizes = [10, 1], strides = [1, 1]} : vector<16x128xf32> to vector<10x1xf32>
    %78 = vector.broadcast %77 : vector<10x1xf32> to vector<10x512xf32>
    %79 = arith.addf %76, %78 : vector<10x512xf32>
    %cst_3 = arith.constant 0.000000e+00 : f32
    %80 = vector.broadcast %cst_3 : f32 to vector<10x512xf32>
    %81 = arith.maximumf %79, %80 : vector<10x512xf32>
    %82 = vector.extract_strided_slice %1 {offsets = [0, 14], sizes = [1, 1], strides = [1, 1]} : vector<16x128xf32> to vector<1x1xf32>
    %83 = vector.extract_strided_slice %81 {offsets = [0, 0], sizes = [1, 512], strides = [1, 1]} : vector<10x512xf32> to vector<1x512xf32>
    %84 = vector.broadcast %82 : vector<1x1xf32> to vector<1x512xf32>
    %85 = arith.mulf %84, %83 : vector<1x512xf32>
    %86 = vector.extract_strided_slice %1 {offsets = [1, 14], sizes = [1, 1], strides = [1, 1]} : vector<16x128xf32> to vector<1x1xf32>
    %87 = vector.extract_strided_slice %81 {offsets = [1, 0], sizes = [1, 512], strides = [1, 1]} : vector<10x512xf32> to vector<1x512xf32>
    %88 = vector.broadcast %86 : vector<1x1xf32> to vector<1x512xf32>
    %89 = arith.mulf %88, %87 : vector<1x512xf32>
    %90 = arith.addf %85, %89 : vector<1x512xf32>
    %91 = vector.extract_strided_slice %1 {offsets = [2, 14], sizes = [1, 1], strides = [1, 1]} : vector<16x128xf32> to vector<1x1xf32>
    %92 = vector.extract_strided_slice %81 {offsets = [2, 0], sizes = [1, 512], strides = [1, 1]} : vector<10x512xf32> to vector<1x512xf32>
    %93 = vector.broadcast %91 : vector<1x1xf32> to vector<1x512xf32>
    %94 = arith.mulf %93, %92 : vector<1x512xf32>
    %95 = arith.addf %90, %94 : vector<1x512xf32>
    %96 = vector.extract_strided_slice %1 {offsets = [3, 14], sizes = [1, 1], strides = [1, 1]} : vector<16x128xf32> to vector<1x1xf32>
    %97 = vector.extract_strided_slice %81 {offsets = [3, 0], sizes = [1, 512], strides = [1, 1]} : vector<10x512xf32> to vector<1x512xf32>
    %98 = vector.broadcast %96 : vector<1x1xf32> to vector<1x512xf32>
    %99 = arith.mulf %98, %97 : vector<1x512xf32>
    %100 = arith.addf %95, %99 : vector<1x512xf32>
    %101 = vector.extract_strided_slice %1 {offsets = [4, 14], sizes = [1, 1], strides = [1, 1]} : vector<16x128xf32> to vector<1x1xf32>
    %102 = vector.extract_strided_slice %81 {offsets = [4, 0], sizes = [1, 512], strides = [1, 1]} : vector<10x512xf32> to vector<1x512xf32>
    %103 = vector.broadcast %101 : vector<1x1xf32> to vector<1x512xf32>
    %104 = arith.mulf %103, %102 : vector<1x512xf32>
    %105 = arith.addf %100, %104 : vector<1x512xf32>
    %106 = vector.extract_strided_slice %1 {offsets = [5, 14], sizes = [1, 1], strides = [1, 1]} : vector<16x128xf32> to vector<1x1xf32>
    %107 = vector.extract_strided_slice %81 {offsets = [5, 0], sizes = [1, 512], strides = [1, 1]} : vector<10x512xf32> to vector<1x512xf32>
    %108 = vector.broadcast %106 : vector<1x1xf32> to vector<1x512xf32>
    %109 = arith.mulf %108, %107 : vector<1x512xf32>
    %110 = arith.addf %105, %109 : vector<1x512xf32>
    %111 = vector.extract_strided_slice %1 {offsets = [6, 14], sizes = [1, 1], strides = [1, 1]} : vector<16x128xf32> to vector<1x1xf32>
    %112 = vector.extract_strided_slice %81 {offsets = [6, 0], sizes = [1, 512], strides = [1, 1]} : vector<10x512xf32> to vector<1x512xf32>
    %113 = vector.broadcast %111 : vector<1x1xf32> to vector<1x512xf32>
    %114 = arith.mulf %113, %112 : vector<1x512xf32>
    %115 = arith.addf %110, %114 : vector<1x512xf32>
    %116 = vector.extract_strided_slice %1 {offsets = [7, 14], sizes = [1, 1], strides = [1, 1]} : vector<16x128xf32> to vector<1x1xf32>
    %117 = vector.extract_strided_slice %81 {offsets = [7, 0], sizes = [1, 512], strides = [1, 1]} : vector<10x512xf32> to vector<1x512xf32>
    %118 = vector.broadcast %116 : vector<1x1xf32> to vector<1x512xf32>
    %119 = arith.mulf %118, %117 : vector<1x512xf32>
    %120 = arith.addf %115, %119 : vector<1x512xf32>
    %121 = vector.extract_strided_slice %1 {offsets = [8, 14], sizes = [1, 1], strides = [1, 1]} : vector<16x128xf32> to vector<1x1xf32>
    %122 = vector.extract_strided_slice %81 {offsets = [8, 0], sizes = [1, 512], strides = [1, 1]} : vector<10x512xf32> to vector<1x512xf32>
    %123 = vector.broadcast %121 : vector<1x1xf32> to vector<1x512xf32>
    %124 = arith.mulf %123, %122 : vector<1x512xf32>
    %125 = arith.addf %120, %124 : vector<1x512xf32>
    %126 = vector.extract_strided_slice %1 {offsets = [9, 14], sizes = [1, 1], strides = [1, 1]} : vector<16x128xf32> to vector<1x1xf32>
    %127 = vector.extract_strided_slice %81 {offsets = [9, 0], sizes = [1, 512], strides = [1, 1]} : vector<10x512xf32> to vector<1x512xf32>
    %128 = vector.broadcast %126 : vector<1x1xf32> to vector<1x512xf32>
    %129 = arith.mulf %128, %127 : vector<1x512xf32>
    %130 = arith.addf %125, %129 : vector<1x512xf32>
    %131 = vector.extract_strided_slice %1 {offsets = [0, 15], sizes = [1, 1], strides = [1, 1]} : vector<16x128xf32> to vector<1x1xf32>
    %132 = vector.broadcast %131 : vector<1x1xf32> to vector<1x512xf32>
    %133 = arith.addf %130, %132 : vector<1x512xf32>
    %c0_4 = arith.constant 0 : index
    %c0_5 = arith.constant 0 : index
    %134 = vector.load %arg3[%c0_4, %c0_5] : memref<1x512xf32, #tpu.memory_space<vmem>>, vector<1x512xf32>
    tpu.vector_store %arg3[%c0_4, %c0_5], %133 {strides = array<i32>} : memref<1x512xf32, #tpu.memory_space<vmem>>, vector<1x512xf32>,
    return
  }
  func.func @transform_0(%arg0: i32) -> (i32, i32) {
    %c0_i32 = arith.constant 0 : i32
    %c0_i32_0 = arith.constant 0 : i32
    return %c0_i32, %arg0 : i32, i32
  }
  func.func @transform_1(%arg0: i32) -> (i32, i32) {
    %c0_i32 = arith.constant 0 : i32
    %c0_i32_0 = arith.constant 0 : i32
    %c0_i32_1 = arith.constant 0 : i32
    return %c0_i32, %c0_i32_0 : i32, i32
  }
  func.func @transform_2(%arg0: i32) -> (i32, i32) {
    %c0_i32 = arith.constant 0 : i32
    %c0_i32_0 = arith.constant 0 : i32
    return %c0_i32, %arg0 : i32, i32
  }
}

</mosaic_0001>

<bundles_post_ra>
// kernel: circle_model_sigma.2
= control target key start
LH: loop header
LB: loop body
LE: loop exit
PB: predicated region body
PF: predicated region fallthrough
CT: control target
= control target key end

     0   :  { %7 = vsyncpa [#allocation3], 0  ;;  %s1348_s0 = inlined_call_operand.vmem [shape: f32[16,128], index: 0, kind: input, shape index: {}]   ;;  %s1349_s1 = inlined_call_operand.vmem [shape: f32[1000,2], index: 1, kind: input, shape index: {}]   ;;  %s1350_s2 = inlined_call_operand.hbm [shape: f32[1,1000], index: 2, kind: output, shape index: {}]  }
   0x1   :  { %9 = vsyncpa [#allocation3 + $0x1], 0  ;;  %s976_s9 = smov 0   ;;  %s978_s10 = smov 0  }
   0x2   :  { %s980_s11 = smov 0   ;;  %s982_s12 = smov 0  }
   0x3 LB: > { %s782_s13 = sadd.s32 4294967295, %s943_s12   ;;  %s783_s14 = sadd.s32 4294967294, %s943_s12   ;;  %s943_s12 = sphi %s982_s12, %s1356_s12   ;;  %s939_s11 = sphi %s980_s11, %s1355_s11   ;;  %s935_s10 = sphi %s978_s10, %s1354_s10   ;;  %s931_s9 = sphi %s976_s9, %s1353_s9  }
   0x4   : > { %s999_s15 = sadd.s32 1, %s943_s12   ;;  %s69_s16 = sadd.s32 1, %s939_s11 }
   0x5   : > { %s66_s17 = ssub.s32 %s943_s12, %s999_s15  ;;  %p79_p0 = scmp.ne.s32.totalorder %s939_s11, %s935_s10 }
   0x6   : > { %p67_p1 = scmp.eq.s32.totalorder %s66_s17, 0  ;;  %p80_p2 = scmp.eq.s32.totalorder %s782_s13, 1 }
   0x7   : > { %p85_p3 = scmp.ne.s32.totalorder %s935_s10, %s931_s9  ;;  %p86_p4 = scmp.eq.s32.totalorder %s783_s14, 1 }
   0x8   : > { %s1011_s18 = scalar_select %p67_p1, %s939_s11, %s69_s16  }
   0x9   : > { %p1013_p5 = por %p80_p2, %p79_p0  ;;  %p1017_p6 = por %p86_p4, %p85_p3 }
   0xa   : > { %p786_p7 = scmp.ge.s32.totalorder %s943_s12, 1  ;;  %p116_p8 = scmp.lt.s32.totalorder %s943_s12, 3 }
   0xc   : > { %p117_p9 = pnand %p786_p7, %p116_p8 }
   0xe   : > { %120 = sbr.rel (%p117_p9) target bundleno = 253 (0xfd), region = 28 }
  0x13   : > { %v1026_v0 = vld [vmem:[%s1348_s0] sm:$0xff]  ;;  %v945_v1 = vmov 2   ;;  %v946_v2 = vmov 1   ;;  %v947_v3 = vmov 0   ;;  %v1034_v4 = vld [vmem:[%s1348_s0 + $0x8] sm:$0xff]  ;;  %v948_v5 = vmov 4  }
  0x14   : > { %854 = vset.pattern.permute.xlu2 %v945_v1  ;;  %853 = vset.pattern.permute.xlu1 %v946_v2  ;;  %v949_v6 = vmov 3   ;;  %v950_v7 = vmov 5   ;;  %v951_v8 = vmov 6   ;;  %v952_v9 = vmov 8   ;;  %s1056_s25 = sshll.u32 %s782_s13, 2  ;;  %s135_s3 = sand.u32 1, %s935_s10  }
  0x15   : > { %852 = vset.pattern.permute.xlu0 %v947_v3  ;;  %238 = vperm.xlu2 %854, %v1026_v0   ;;  %v953_v10 = vmov 7   ;;  %v954_v11 = vmov 12   ;;  %v955_v12 = vmov 9   ;;  %v956_v13 = vmov 11   ;;  %p139_p10 = scmp.lt.s32.totalorder %s1056_s25, 7  ;;  %s1312_s4 = sshll.u32 %s135_s3, 2 }
  0x16   : > { %202 = vperm.xlu1 %853, %v1026_v0   ;;  %172 = vperm.xlu0 %852, %v1026_v0   ;;  %v957_v14 = vmov 10   ;;  %v958_v15 = vmov 14   ;;  %v959_v16 = vmov 13   ;;  %v960_v18 = vmov 15   ;;  %s719_s7 = scalar_lea.hbm %s1350_s2, %s1056_s25  ;;  %s137_s8 = scalar_lea.vmem [#allocation2], %s1312_s4 }
  0x17   : > { %s140_s26 = scalar_select %p139_p10, %s1056_s25, 7  ;;  %vm696_vm0 = vcmask 1040384   ;;  %vm698_vm1 = vcmask 1042434   ;;  %vm700_vm2 = vcmask 1041408  }
  0x18   : > { %s721_s13 = sshll.u32 %s137_s8, 4  ;;  %s723_s14 = sshll.u32 %s719_s7, 4  ;;  %s722_s13 = int_to_ptr.vmem [resolvable:$true] %s721_s13  ;;  %s724_s14 = int_to_ptr.hbm [resolvable:$true] %s723_s14 }
  0x19   : > { %s789_s27 = sshll.u32 %s140_s26, 1  ;;  %s709_s16 = scalar_lea.sflag [#allocation3], %s135_s3 }
  0x1a   : > { %s142_s30 = scalar_lea.vmem %s1349_s1, %s789_s27  ;;  %s895_s17 = sshra.s32 %s724_s14, 4  ;;  %s896_s17 = int_to_ptr.hbm [resolvable:$true] %s895_s17 }
  0x1b   : > { %v145_v17 = vld [vmem:[%s142_s30] sm:$0xff]   ;;  %s897_s21 = scalar_lea.hbm %s896_s17, 4  ;;  %s901_s24 = scalar_lea.hbm %s1350_s2, 8 }
  0x1c   : > { %148 = vst [vmem:[#allocation4] sm:$0xff] %v145_v17   ;;  %p898_p11 = scmp.ne.s32.totalorder %s896_s17, %s897_s21  ;;  %p902_p0 = scmp.lt.s32.totalorder %s896_s17, %s1350_s2 }
  0x1d   : > { %242 = vperm.xlu2 %854, %v1034_v4   ;;  %p903_p1 = scmp.lt.s32.totalorder %s901_s24, %s897_s21 }
  0x1e   : > { %206 = vperm.xlu1 %853, %v1034_v4   ;;  %177 = vperm.xlu0 %852, %v1034_v4   ;;  %p899_p12 = pnand %p898_p11, %p1013_p5 }
  0x1f   : > { %p904_p2 = por %p903_p1, %p902_p0 }
  0x20   : > { %p900_p13 = pneg %p899_p12 }
  0x22   : > { %p905_p3 = pnand %p904_p2, %p900_p13 }
  0x23   : > { %v167_v22 = vld [vmem:[#allocation4] sm:$0xff] }
  0x24   : > { %v209_v23 = vperm.slane %v167_v22, 1  ;;  %v210_v24 = vperm.slane %v167_v22, 3  ;;  %v211_v25 = vperm.slane %v167_v22, 5  ;;  %v212_v26 = vperm.slane %v167_v22, 7 }
  0x25   : > { %857 = vset.pattern.permute.xlu2 %v948_v5  ;;  %v181_v27 = vperm.slane %v167_v22, 0  ;;  %v182_v28 = vperm.slane %v167_v22, 2  ;;  %v183_v29 = vperm.slane %v167_v22, 4  ;;  %v184_v30 = vperm.slane %v167_v22, 6 }
  0x26   : > { %856 = vset.pattern.permute.xlu1 %v949_v6  ;;  %855 = vset.pattern.permute.xlu0 %v949_v6  ;;  %v217_v32 = vperm.slane %v209_v23, 1  ;;  %v218_v33 = vperm.slane %v210_v24, 1  ;;  %v219_v34 = vperm.slane %v211_v25, 1  ;;  %v220_v35 = vperm.slane %v212_v26, 1 }
  0x27   : > { %282 = vperm.xlu2 %857, %v1026_v0   ;;  %266 = vperm.xlu1 %856, %v1034_v4   ;;  %v189_v37 = vperm.slane %v181_v27, 0  ;;  %v190_v38 = vperm.slane %v182_v28, 0  ;;  %v191_v39 = vperm.slane %v183_v29, 0  ;;  %v192_v40 = vperm.slane %v184_v30, 0 }
  0x28   : > { %262 = vperm.xlu0 %855, %v1026_v0  }
  0x2f   : > { %859 = vset.pattern.permute.xlu2 %v950_v7  ;;  %858 = vset.pattern.permute.xlu1 %v948_v5 }
  0x30   : > { %860 = vset.pattern.permute.xlu0 %v950_v7  ;;  %310 = vperm.xlu2 %859, %v1026_v0  }
  0x31   : > { %286 = vperm.xlu1 %858, %v1034_v4   ;;  %314 = vperm.xlu0 %860, %v1034_v4  }
  0x38   : > { %862 = vset.pattern.permute.xlu2 %v951_v8 }
  0x39   : > { %861 = vset.pattern.permute.xlu1 %v951_v8  ;;  %865 = vset.pattern.permute.xlu0 %v952_v9 }
  0x3a   : > { %342 = vperm.xlu2 %862, %v1034_v4   ;;  %338 = vperm.xlu1 %861, %v1026_v0  }
  0x3b   : > { %394 = vperm.xlu0 %865, %v1026_v0  }
  0x42   : > { %864 = vset.pattern.permute.xlu2 %v953_v10  ;;  %863 = vset.pattern.permute.xlu1 %v953_v10 }
  0x43   : > { %870 = vset.pattern.permute.xlu0 %v954_v11  ;;  %370 = vperm.xlu2 %864, %v1034_v4  }
  0x44   : > { %366 = vperm.xlu1 %863, %v1026_v0   ;;  %506 = vperm.xlu0 %870, %v1026_v0  }
  0x4b   : > { %867 = vset.pattern.permute.xlu2 %v955_v12 }
  0x4c   : > { %866 = vset.pattern.permute.xlu1 %v952_v9  ;;  %875 = vset.pattern.permute.xlu0 %v956_v13 }
  0x4d   : > { %422 = vperm.xlu2 %867, %v1026_v0   ;;  %398 = vperm.xlu1 %866, %v1034_v4  }
  0x4e   : > { %482 = vperm.xlu0 %875, %v1034_v4  }
  0x55   : > { %869 = vset.pattern.permute.xlu2 %v956_v13  ;;  %868 = vset.pattern.permute.xlu1 %v957_v14 }
  0x56   : > { %478 = vperm.xlu2 %869, %v1026_v0   ;;  %450 = vperm.xlu1 %868, %v1026_v0  }
  0x57   : > { %880 = vset.pattern.permute.xlu0 %v960_v18 }
  0x5e   : > { %872 = vset.pattern.permute.xlu2 %v958_v15  ;;  %871 = vset.pattern.permute.xlu1 %v959_v16 }
  0x5f   : > { %558 = vperm.xlu2 %872, %v1026_v0   ;;  %534 = vperm.xlu1 %871, %v1026_v0  }
  0x67   : > { %874 = vset.pattern.permute.xlu2 %v957_v14  ;;  %873 = vset.pattern.permute.xlu1 %v955_v12 }
  0x68   : > { %454 = vperm.xlu2 %874, %v1034_v4   ;;  %426 = vperm.xlu1 %873, %v1034_v4  }
  0x6f   : > { %v239_v19 = vpop.permute.xlu2 %238 }
  0x70   : > { %876 = vset.pattern.permute.xlu1 %v954_v11  ;;  %877 = vset.pattern.permute.xlu2 %v959_v16 }
  0x71   : > { %510 = vperm.xlu1 %876, %v1034_v4   ;;  %538 = vperm.xlu2 %877, %v1034_v4  }
  0x77   : > { %v1073_v20 = vpop.permute.xlu2 %242 }
  0x79   : > { %878 = vset.pattern.permute.xlu1 %v958_v15  ;;  %879 = vset.pattern.permute.xlu2 %v960_v18 }
  0x7a   : > { %654 = vperm.xlu1 %878, %v1034_v4   ;;  %682 = vperm.xlu2 %879, %v1026_v0  }
  0x81   : > { %v1075_v31 = vpop.permute.xlu2 %282 }
  0x88   : > { %v203_v21 = vpop.permute.xlu1 %202  ;;  %v173_v41 = vpop.permute.xlu0 %172 }
  0x89   : > { %v221_v42 = vmul.f32 %v217_v32, %v203_v21  ;;  %v222_v43 = vmul.f32 %v218_v33, %v203_v21  ;;  %v223_v44 = vmul.f32 %v219_v34, %v203_v21  ;;  %v224_v45 = vmul.f32 %v220_v35, %v203_v21 }
  0x8a   : > { %v193_v46 = vmul.f32 %v189_v37, %v173_v41  ;;  %v194_v47 = vmul.f32 %v190_v38, %v173_v41  ;;  %v195_v48 = vmul.f32 %v191_v39, %v173_v41  ;;  %v196_v49 = vmul.f32 %v192_v40, %v173_v41  ;;  %v311_v55 = vpop.permute.xlu2 %310 }
  0x8c   : > { %v229_v50 = vadd.f32 %v221_v42, %v193_v46  ;;  %v230_v51 = vadd.f32 %v222_v43, %v194_v47  ;;  %v231_v52 = vadd.f32 %v223_v44, %v195_v48  ;;  %v232_v53 = vadd.f32 %v224_v45, %v196_v49 }
  0x8e   : > { %v245_v56 = vadd.f32 %v239_v19, %v229_v50  ;;  %v246_v57 = vadd.f32 %v239_v19, %v230_v51  ;;  %v247_v58 = vadd.f32 %v239_v19, %v231_v52  ;;  %v248_v59 = vadd.f32 %v239_v19, %v232_v53 }
  0x90   : > { %v207_v36 = vpop.permute.xlu1 %206  ;;  %v178_v60 = vpop.permute.xlu0 %177  ;;  %v1079_v61 = vmax.f32 %v245_v56, 0.0  ;;  %v1081_v62 = vmax.f32 %v246_v57, 0.0  ;;  %v1083_v63 = vmax.f32 %v247_v58, 0.0  ;;  %v1085_v0 = vmax.f32 %v248_v59, 0.0 }
  0x91   : > { %v225_v2 = vmul.f32 %v217_v32, %v207_v36  ;;  %v226_v3 = vmul.f32 %v218_v33, %v207_v36  ;;  %v227_v4 = vmul.f32 %v219_v34, %v207_v36  ;;  %v228_v5 = vmul.f32 %v220_v35, %v207_v36 }
  0x92   : > { %v317_v7 = vperm.slane %v1079_v61, 2  ;;  %v318_v8 = vperm.slane %v1081_v62, 2  ;;  %v319_v9 = vperm.slane %v1083_v63, 2  ;;  %v320_v10 = vperm.slane %v1085_v0, 2 }
  0x93   : > { %v197_v11 = vmul.f32 %v189_v37, %v178_v60  ;;  %v198_v12 = vmul.f32 %v190_v38, %v178_v60  ;;  %v199_v13 = vmul.f32 %v191_v39, %v178_v60  ;;  %v200_v14 = vmul.f32 %v192_v40, %v178_v60 }
  0x94   : > { %v343_v6 = vpop.permute.xlu2 %342  ;;  %v321_v16 = vmul.f32 %v317_v7, %v311_v55  ;;  %v322_v17 = vmul.f32 %v318_v8, %v311_v55  ;;  %v323_v18 = vmul.f32 %v319_v9, %v311_v55  ;;  %v324_v19 = vmul.f32 %v320_v10, %v311_v55 }
  0x95   : > { %v233_v21 = vadd.f32 %v225_v2, %v197_v11  ;;  %v234_v22 = vadd.f32 %v226_v3, %v198_v12  ;;  %v235_v23 = vadd.f32 %v227_v4, %v199_v13  ;;  %v236_v24 = vadd.f32 %v228_v5, %v200_v14 }
  0x96   : > { %v269_v25 = vperm.slane %v1079_v61, 0  ;;  %v270_v26 = vperm.slane %v1081_v62, 0  ;;  %v271_v27 = vperm.slane %v1083_v63, 0  ;;  %v272_v28 = vperm.slane %v1085_v0, 0 }
  0x97   : > { %v289_v29 = vperm.slane %v1079_v61, 1  ;;  %v290_v30 = vperm.slane %v1081_v62, 1  ;;  %v291_v32 = vperm.slane %v1083_v63, 1  ;;  %v292_v33 = vperm.slane %v1085_v0, 1 }
  0x98   : > { %v345_v35 = vperm.slane %v1079_v61, 3  ;;  %v346_v36 = vperm.slane %v1081_v62, 3  ;;  %v347_v37 = vperm.slane %v1083_v63, 3  ;;  %v348_v38 = vperm.slane %v1085_v0, 3 }
  0x99   : > { %v1077_v54 = vpop.permute.xlu1 %266  ;;  %v1116_v44 = vadd.f32 %v1073_v20, %v233_v21  ;;  %v1119_v45 = vadd.f32 %v1073_v20, %v234_v22  ;;  %v1122_v46 = vadd.f32 %v1073_v20, %v235_v23  ;;  %v1125_v47 = vadd.f32 %v1073_v20, %v236_v24 }
  0x9a   : > { %v263_v15 = vpop.permute.xlu0 %262  ;;  %v293_v48 = vmul.f32 %v289_v29, %v1075_v31  ;;  %v294_v49 = vmul.f32 %v290_v30, %v1075_v31  ;;  %v295_v50 = vmul.f32 %v291_v32, %v1075_v31  ;;  %v296_v51 = vmul.f32 %v292_v33, %v1075_v31 }
  0x9b   : > { %v273_v39 = vmul.f32 %v269_v25, %v263_v15  ;;  %v274_v40 = vmul.f32 %v270_v26, %v263_v15  ;;  %v275_v41 = vmul.f32 %v271_v27, %v263_v15  ;;  %v276_v42 = vmul.f32 %v272_v28, %v263_v15 }
  0x9c   : > { %v1131_v52 = vmul.f32 %v345_v35, %v343_v6  ;;  %v1133_v53 = vmul.f32 %v346_v36, %v343_v6  ;;  %v1135_v55 = vmul.f32 %v347_v37, %v343_v6  ;;  %v1137_v56 = vmul.f32 %v348_v38, %v343_v6 }
  0x9d   : > { %v1113_v43 = vpop.permute.xlu2 %370  ;;  %v301_v57 = vadd.f32 %v293_v48, %v273_v39  ;;  %v302_v58 = vadd.f32 %v294_v49, %v274_v40  ;;  %v303_v20 = vadd.f32 %v295_v50, %v275_v41  ;;  %v304_v59 = vadd.f32 %v296_v51, %v276_v42 }
  0x9e   : > { %v277_v2 = vmul.f32 %v269_v25, %v1077_v54  ;;  %v278_v3 = vmul.f32 %v270_v26, %v1077_v54  ;;  %v279_v4 = vmul.f32 %v271_v27, %v1077_v54  ;;  %v280_v31 = vmul.f32 %v272_v28, %v1077_v54 }
  0x9f   : > { %v373_v5 = vperm.slane %v1079_v61, 4  ;;  %v374_v11 = vperm.slane %v1081_v62, 4  ;;  %v375_v6 = vperm.slane %v1083_v63, 4  ;;  %v376_v12 = vperm.slane %v1085_v0, 4 }
  0xa0   : > { %v429_v13 = vperm.slane %v1079_v61, 6  ;;  %v430_v14 = vperm.slane %v1081_v62, 6  ;;  %v431_v15 = vperm.slane %v1083_v63, 6  ;;  %v432_v21 = vperm.slane %v1085_v0, 6 }
  0xa1   : > { %v329_v22 = vadd.f32 %v321_v16, %v301_v57  ;;  %v330_v23 = vadd.f32 %v322_v17, %v302_v58  ;;  %v331_v24 = vadd.f32 %v323_v18, %v303_v20  ;;  %v332_v54 = vadd.f32 %v324_v19, %v304_v59 }
  0xa2   : > { %v401_v41 = vperm.slane %v1079_v61, 5  ;;  %v402_v42 = vperm.slane %v1081_v62, 5  ;;  %v403_v48 = vperm.slane %v1083_v63, 5  ;;  %v404_v16 = vperm.slane %v1085_v0, 5 }
  0xa3   : > { %v1087_v1 = vpop.permute.xlu1 %286  ;;  %v315_v60 = vpop.permute.xlu0 %314 }
  0xa4   : > { %v297_v26 = vmul.f32 %v289_v29, %v1087_v1  ;;  %v298_v27 = vmul.f32 %v290_v30, %v1087_v1  ;;  %v299_v28 = vmul.f32 %v291_v32, %v1087_v1  ;;  %v300_v39 = vmul.f32 %v292_v33, %v1087_v1 }
  0xa5   : > { %v325_v17 = vmul.f32 %v317_v7, %v315_v60  ;;  %v326_v18 = vmul.f32 %v318_v8, %v315_v60  ;;  %v327_v19 = vmul.f32 %v319_v9, %v315_v60  ;;  %v328_v1 = vmul.f32 %v320_v10, %v315_v60 }
  0xa6   : > { %v305_v49 = vadd.f32 %v297_v26, %v277_v2  ;;  %v306_v50 = vadd.f32 %v298_v27, %v278_v3  ;;  %v307_v51 = vadd.f32 %v299_v28, %v279_v4  ;;  %v308_v57 = vadd.f32 %v300_v39, %v280_v31 }
  0xa7   : > { %v423_v40 = vpop.permute.xlu2 %422 }
  0xa8   : > { %v333_v2 = vadd.f32 %v325_v17, %v305_v49  ;;  %v334_v3 = vadd.f32 %v326_v18, %v306_v50  ;;  %v335_v4 = vadd.f32 %v327_v19, %v307_v51  ;;  %v336_v31 = vadd.f32 %v328_v1, %v308_v57 }
  0xaa   : > { %v361_v18 = vadd.f32 %v1131_v52, %v333_v2  ;;  %v362_v19 = vadd.f32 %v1133_v53, %v334_v3  ;;  %v363_v1 = vadd.f32 %v1135_v55, %v335_v4  ;;  %v457_v55 = vperm.slane %v1079_v61, 7 }
  0xac   : > { %v339_v34 = vpop.permute.xlu1 %338 }
  0xad   : > { %v349_v29 = vmul.f32 %v345_v35, %v339_v34  ;;  %v350_v30 = vmul.f32 %v346_v36, %v339_v34  ;;  %v351_v32 = vmul.f32 %v347_v37, %v339_v34  ;;  %v352_v33 = vmul.f32 %v348_v38, %v339_v34  ;;  %v395_v58 = vpop.permute.xlu0 %394 }
  0xae   : > { %v257_v35 = vmax.f32 %v1116_v44, 0.0  ;;  %v258_v34 = vmax.f32 %v1119_v45, 0.0  ;;  %v259_v36 = vmax.f32 %v1122_v46, 0.0  ;;  %v260_v37 = vmax.f32 %v1125_v47, 0.0 }
  0xaf   : > { %v357_v38 = vadd.f32 %v349_v29, %v329_v22  ;;  %v358_v20 = vadd.f32 %v350_v30, %v330_v23  ;;  %v359_v59 = vadd.f32 %v351_v32, %v331_v24  ;;  %v360_v60 = vadd.f32 %v352_v33, %v332_v54 }
  0xb0   : > { %v433_v45 = vmul.f32 %v429_v13, %v423_v40  ;;  %v434_v46 = vmul.f32 %v430_v14, %v423_v40  ;;  %v435_v47 = vmul.f32 %v431_v15, %v423_v40  ;;  %v436_v22 = vmul.f32 %v432_v21, %v423_v40  ;;  %v479_v17 = vpop.permute.xlu2 %478 }
  0xb1   : > { %v405_v23 = vmul.f32 %v401_v41, %v395_v58  ;;  %v406_v24 = vmul.f32 %v402_v42, %v395_v58  ;;  %v407_v54 = vmul.f32 %v403_v48, %v395_v58  ;;  %v408_v39 = vmul.f32 %v404_v16, %v395_v58 }
  0xb2   : > { %v364_v40 = vadd.f32 %v1137_v56, %v336_v31  ;;  %v1201_v49 = vperm.slane %v257_v35, 1  ;;  %v1203_v50 = vperm.slane %v258_v34, 1  ;;  %v1205_v51 = vperm.slane %v259_v36, 1 }
  0xb3   : > { %v1207_v57 = vperm.slane %v260_v37, 1  ;;  %v485_v52 = vperm.slane %v257_v35, 0  ;;  %v487_v53 = vperm.slane %v259_v36, 0  ;;  %v458_v56 = vperm.slane %v1081_v62, 7 }
  0xb5   : > { %v489_v4 = vmul.f32 %v485_v52, %v479_v17 }
  0xb6   : > { %v367_v25 = vpop.permute.xlu1 %366  ;;  %v507_v58 = vpop.permute.xlu0 %506 }
  0xb7   : > { %v377_v7 = vmul.f32 %v373_v5, %v367_v25  ;;  %v378_v8 = vmul.f32 %v374_v11, %v367_v25  ;;  %v379_v9 = vmul.f32 %v375_v6, %v367_v25  ;;  %v380_v10 = vmul.f32 %v376_v12, %v367_v25 }
  0xb9   : > { %v385_v27 = vadd.f32 %v377_v7, %v357_v38  ;;  %v386_v25 = vadd.f32 %v378_v8, %v358_v20  ;;  %v387_v28 = vadd.f32 %v379_v9, %v359_v59  ;;  %v388_v44 = vadd.f32 %v380_v10, %v360_v60 }
  0xba   : > { %v486_v7 = vperm.slane %v258_v34, 0  ;;  %v488_v8 = vperm.slane %v260_v37, 0  ;;  %v459_v9 = vperm.slane %v1083_v63, 7  ;;  %v460_v10 = vperm.slane %v1085_v0, 7  ;;  %v559_v37 = vpop.permute.xlu2 %558 }
  0xbb   : > { %v413_v29 = vadd.f32 %v405_v23, %v385_v27  ;;  %v414_v30 = vadd.f32 %v406_v24, %v386_v25  ;;  %v415_v32 = vadd.f32 %v407_v54, %v387_v28  ;;  %v416_v33 = vadd.f32 %v408_v39, %v388_v44 }
  0xbc   : > { %v490_v31 = vmul.f32 %v486_v7, %v479_v17  ;;  %v491_v27 = vmul.f32 %v487_v53, %v479_v17  ;;  %v492_v25 = vmul.f32 %v488_v8, %v479_v17  ;;  %v519_v23 = vmul.f32 %v1205_v51, %v507_v58 }
  0xbd   : > { %v441_v20 = vadd.f32 %v433_v45, %v413_v29  ;;  %v442_v59 = vadd.f32 %v434_v46, %v414_v30  ;;  %v443_v60 = vadd.f32 %v435_v47, %v415_v32  ;;  %v444_v2 = vadd.f32 %v436_v22, %v416_v33 }
  0xbe   : > { %v517_v47 = vmul.f32 %v1201_v49, %v507_v58  ;;  %v518_v22 = vmul.f32 %v1203_v50, %v507_v58  ;;  %v520_v24 = vmul.f32 %v1207_v57, %v507_v58  ;;  %v381_v17 = vmul.f32 %v373_v5, %v1113_v43 }
  0xbf   : > { %v1179_v26 = vpop.permute.xlu1 %398  ;;  %v382_v32 = vmul.f32 %v374_v11, %v1113_v43  ;;  %v383_v33 = vmul.f32 %v375_v6, %v1113_v43  ;;  %v384_v58 = vmul.f32 %v376_v12, %v1113_v43 }
  0xc0   : > { %v409_v11 = vmul.f32 %v401_v41, %v1179_v26  ;;  %v410_v6 = vmul.f32 %v402_v42, %v1179_v26  ;;  %v411_v43 = vmul.f32 %v403_v48, %v1179_v26  ;;  %v412_v12 = vmul.f32 %v404_v16, %v1179_v26 }
  0xc1   : > { %v392_v5 = vadd.f32 %v384_v58, %v364_v40 }
  0xc8   : > { %v451_v38 = vpop.permute.xlu1 %450 }
  0xc9   : > { %v461_v3 = vmul.f32 %v457_v55, %v451_v38  ;;  %v462_v35 = vmul.f32 %v458_v56, %v451_v38  ;;  %v463_v34 = vmul.f32 %v459_v9, %v451_v38  ;;  %v464_v36 = vmul.f32 %v460_v10, %v451_v38 }
  0xcb   : > { %v469_v28 = vadd.f32 %v461_v3, %v441_v20  ;;  %v470_v44 = vadd.f32 %v462_v35, %v442_v59  ;;  %v471_v45 = vadd.f32 %v463_v34, %v443_v60  ;;  %v472_v46 = vadd.f32 %v464_v36, %v444_v2  ;;  %v483_v34 = vpop.permute.xlu0 %482 }
  0xcc   : > { %v389_v2 = vadd.f32 %v381_v17, %v361_v18  ;;  %v390_v3 = vadd.f32 %v382_v32, %v362_v19  ;;  %v391_v35 = vadd.f32 %v383_v33, %v363_v1  ;;  %v495_v41 = vmul.f32 %v487_v53, %v483_v34 }
  0xcd   : > { %v497_v54 = vadd.f32 %v489_v4, %v469_v28  ;;  %v498_v39 = vadd.f32 %v490_v31, %v470_v44  ;;  %v499_v29 = vadd.f32 %v491_v27, %v471_v45  ;;  %v500_v30 = vadd.f32 %v492_v25, %v472_v46  ;;  %v455_v25 = vpop.permute.xlu2 %454 }
  0xce   : > { %v493_v4 = vmul.f32 %v485_v52, %v483_v34  ;;  %v494_v31 = vmul.f32 %v486_v7, %v483_v34  ;;  %v496_v27 = vmul.f32 %v488_v8, %v483_v34  ;;  %v417_v46 = vadd.f32 %v409_v11, %v389_v2 }
  0xcf   : > { %v525_v38 = vadd.f32 %v517_v47, %v497_v54  ;;  %v526_v20 = vadd.f32 %v518_v22, %v498_v39  ;;  %v527_v59 = vadd.f32 %v519_v23, %v499_v29  ;;  %v528_v60 = vadd.f32 %v520_v24, %v500_v30 }
  0xd0   : > { %v418_v48 = vadd.f32 %v410_v6, %v390_v3  ;;  %v419_v47 = vadd.f32 %v411_v43, %v391_v35  ;;  %v420_v22 = vadd.f32 %v412_v12, %v392_v5  ;;  %v465_v52 = vmul.f32 %v457_v55, %v455_v25 }
  0xd1   : > { %v535_v18 = vpop.permute.xlu1 %534  ;;  %v466_v7 = vmul.f32 %v458_v56, %v455_v25  ;;  %v467_v53 = vmul.f32 %v459_v9, %v455_v25  ;;  %v468_v8 = vmul.f32 %v460_v10, %v455_v25 }
  0xd2   : > { %v541_v19 = vadd.f32 %v535_v18, %v525_v38  ;;  %v542_v1 = vadd.f32 %v535_v18, %v526_v20  ;;  %v543_v40 = vadd.f32 %v535_v18, %v527_v59  ;;  %v544_v36 = vadd.f32 %v535_v18, %v528_v60 }
  0xd4   : > { %v549_v28 = vmax.f32 %v541_v19, 0.0  ;;  %v550_v42 = vmax.f32 %v542_v1, 0.0  ;;  %v551_v44 = vmax.f32 %v543_v40, 0.0  ;;  %v552_v45 = vmax.f32 %v544_v36, 0.0 }
  0xd6   : > { %v1249_v23 = vmul.f32 %v559_v37, %v549_v28  ;;  %v1251_v16 = vmul.f32 %v559_v37, %v550_v42  ;;  %v1253_v26 = vmul.f32 %v559_v37, %v551_v44  ;;  %v1255_v24 = vmul.f32 %v559_v37, %v552_v45 }
  0xd8   : > { %v569_v54 = vrot.slane %v1249_v23, 1  ;;  %v570_v39 = vrot.slane %v1251_v16, 1  ;;  %v571_v29 = vrot.slane %v1253_v26, 1  ;;  %v572_v37 = vrot.slane %v1255_v24, 1 }
  0xd9   : > { %v581_v30 = vrot.slane %v1249_v23, 2  ;;  %v582_v55 = vrot.slane %v1251_v16, 2  ;;  %v583_v56 = vrot.slane %v1253_v26, 2  ;;  %v584_v17 = vrot.slane %v1255_v24, 2 }
  0xda   : > { %v427_v9 = vpop.permute.xlu1 %426  ;;  %v577_v32 = vadd.f32 %v569_v54, %v1249_v23  ;;  %v578_v10 = vadd.f32 %v570_v39, %v1251_v16  ;;  %v579_v33 = vadd.f32 %v571_v29, %v1253_v26  ;;  %v580_v58 = vadd.f32 %v572_v37, %v1255_v24 }
  0xdb   : > { %v437_v38 = vmul.f32 %v429_v13, %v427_v9  ;;  %v438_v20 = vmul.f32 %v430_v14, %v427_v9  ;;  %v439_v59 = vmul.f32 %v431_v15, %v427_v9  ;;  %v440_v60 = vmul.f32 %v432_v21, %v427_v9 }
  0xdc   : > { %v589_v2 = vadd.f32 %v581_v30, %v577_v32  ;;  %v590_v3 = vadd.f32 %v582_v55, %v578_v10  ;;  %v591_v35 = vadd.f32 %v583_v56, %v579_v33  ;;  %v592_v5 = vadd.f32 %v584_v17, %v580_v58 }
  0xdd   : > { %v445_v34 = vadd.f32 %v437_v38, %v417_v46  ;;  %v446_v11 = vadd.f32 %v438_v20, %v418_v48  ;;  %v447_v6 = vadd.f32 %v439_v59, %v419_v47  ;;  %v448_v43 = vadd.f32 %v440_v60, %v420_v22 }
  0xde   : > { %v593_v61 = vrot.slane %v1249_v23, 3  ;;  %v594_v13 = vrot.slane %v1251_v16, 3  ;;  %v595_v62 = vrot.slane %v1253_v26, 3  ;;  %v596_v63 = vrot.slane %v1255_v24, 3 }
  0xdf   : > { %v473_v14 = vadd.f32 %v465_v52, %v445_v34  ;;  %v474_v15 = vadd.f32 %v466_v7, %v446_v11  ;;  %v475_v0 = vadd.f32 %v467_v53, %v447_v6  ;;  %v476_v21 = vadd.f32 %v468_v8, %v448_v43  ;;  %v539_v53 = vpop.permute.xlu2 %538 }
  0xe0   : > { %v601_v12 = vadd.f32 %v593_v61, %v589_v2  ;;  %v602_v18 = vadd.f32 %v594_v13, %v590_v3  ;;  %v603_v19 = vadd.f32 %v595_v62, %v591_v35  ;;  %v604_v1 = vadd.f32 %v596_v63, %v592_v5 }
  0xe1   : > { %v501_v40 = vadd.f32 %v493_v4, %v473_v14  ;;  %v502_v36 = vadd.f32 %v494_v31, %v474_v15  ;;  %v503_v25 = vadd.f32 %v495_v41, %v475_v0  ;;  %v504_v28 = vadd.f32 %v496_v27, %v476_v21 }
  0xe2   : > { %v605_v42 = vrot.slane %v1249_v23, 4  ;;  %v606_v44 = vrot.slane %v1251_v16, 4  ;;  %v607_v45 = vrot.slane %v1253_v26, 4  ;;  %v608_v46 = vrot.slane %v1255_v24, 4 }
  0xe3   : > { %v511_v48 = vpop.permute.xlu1 %510  ;;  %v617_v47 = vrot.slane %v1249_v23, 5  ;;  %v618_v22 = vrot.slane %v1251_v16, 5  ;;  %v619_v52 = vrot.slane %v1253_v26, 5  ;;  %v620_v4 = vrot.slane %v1255_v24, 5 }
  0xe4   : > { %v521_v31 = vmul.f32 %v1201_v49, %v511_v48  ;;  %v522_v41 = vmul.f32 %v1203_v50, %v511_v48  ;;  %v523_v27 = vmul.f32 %v1205_v51, %v511_v48  ;;  %v524_v7 = vmul.f32 %v1207_v57, %v511_v48 }
  0xe5   : > { %v613_v8 = vadd.f32 %v605_v42, %v601_v12  ;;  %v614_v54 = vadd.f32 %v606_v44, %v602_v18  ;;  %v615_v39 = vadd.f32 %v607_v45, %v603_v19  ;;  %v616_v29 = vadd.f32 %v608_v46, %v604_v1 }
  0xe6   : > { %v529_v37 = vadd.f32 %v521_v31, %v501_v40  ;;  %v530_v30 = vadd.f32 %v522_v41, %v502_v36  ;;  %v531_v55 = vadd.f32 %v523_v27, %v503_v25  ;;  %v532_v56 = vadd.f32 %v524_v7, %v504_v28 }
  0xe7   : > { %v625_v17 = vadd.f32 %v617_v47, %v613_v8  ;;  %v626_v9 = vadd.f32 %v618_v22, %v614_v54  ;;  %v627_v32 = vadd.f32 %v619_v52, %v615_v39  ;;  %v628_v10 = vadd.f32 %v620_v4, %v616_v29  ;;  %v683_v28 = vpop.permute.xlu2 %682 }
  0xe8   : > { %v545_v49 = vadd.f32 %v539_v53, %v529_v37  ;;  %v546_v33 = vadd.f32 %v539_v53, %v530_v30  ;;  %v547_v50 = vadd.f32 %v539_v53, %v531_v55  ;;  %v548_v58 = vadd.f32 %v539_v53, %v532_v56 }
  0xe9   : > { %v629_v51 = vrot.slane %v1249_v23, 6  ;;  %v630_v57 = vrot.slane %v1251_v16, 6  ;;  %v631_v38 = vrot.slane %v1253_v26, 6  ;;  %v632_v20 = vrot.slane %v1255_v24, 6 }
  0xea   : > { %v553_v59 = vmax.f32 %v545_v49, 0.0  ;;  %v554_v60 = vmax.f32 %v546_v33, 0.0  ;;  %v555_v2 = vmax.f32 %v547_v50, 0.0  ;;  %v556_v3 = vmax.f32 %v548_v58, 0.0 }
  0xeb   : > { %v637_v35 = vadd.f32 %v629_v51, %v625_v17  ;;  %v638_v5 = vadd.f32 %v630_v57, %v626_v9  ;;  %v639_v34 = vadd.f32 %v631_v38, %v627_v32  ;;  %v640_v11 = vadd.f32 %v632_v20, %v628_v10 }
  0xec   : > { %v655_v6 = vpop.permute.xlu1 %654  ;;  %v641_v43 = vrot.slane %v1249_v23, 7  ;;  %v642_v61 = vrot.slane %v1251_v16, 7  ;;  %v643_v13 = vrot.slane %v1253_v26, 7  ;;  %v644_v62 = vrot.slane %v1255_v24, 7 }
  0xed   : > { %v657_v63 = vmul.f32 %v655_v6, %v553_v59  ;;  %v658_v14 = vmul.f32 %v655_v6, %v554_v60  ;;  %v659_v15 = vmul.f32 %v655_v6, %v555_v2  ;;  %v660_v0 = vmul.f32 %v655_v6, %v556_v3 }
  0xee   : > { %v649_v21 = vadd.f32 %v641_v43, %v637_v35  ;;  %v650_v12 = vadd.f32 %v642_v61, %v638_v5  ;;  %v651_v18 = vadd.f32 %v643_v13, %v639_v34  ;;  %v652_v19 = vadd.f32 %v644_v62, %v640_v11 }
  0xef   : > { %v669_v1 = vrot.slane %v657_v63, 1  ;;  %v670_v40 = vrot.slane %v658_v14, 1  ;;  %v671_v23 = vrot.slane %v659_v15, 1  ;;  %v672_v36 = vrot.slane %v660_v0, 1 }
  0xf0   : > { %v661_v16 = vadd.f32 %v657_v63, %v649_v21  ;;  %v662_v26 = vadd.f32 %v658_v14, %v650_v12  ;;  %v663_v24 = vadd.f32 %v659_v15, %v651_v18  ;;  %v664_v25 = vadd.f32 %v660_v0, %v652_v19 }
  0xf1   : > { %v703_v48 = vlaneseq }
  0xf2   : > { %v677_v42 = vadd.f32 %v669_v1, %v661_v16  ;;  %v678_v44 = vadd.f32 %v670_v40, %v662_v26  ;;  %v679_v45 = vadd.f32 %v671_v23, %v663_v24  ;;  %v680_v46 = vadd.f32 %v672_v36, %v664_v25 }
  0xf3   : > { %vm705_vm3 = vcmp.lt.s32.totalorder %v703_v48, 512 }
  0xf4   : > { %v686_v47 = vadd.f32 %v683_v28, %v678_v44  ;;  %v687_v22 = vadd.f32 %v683_v28, %v679_v45  ;;  %v688_v52 = vadd.f32 %v683_v28, %v680_v46  ;;  %v685_v4 = vadd.f32 %v683_v28, %v677_v42 }
  0xf6   : > { %v693_v31 = vrot.slane %v686_v47, 7  ;;  %v694_v41 = vrot.slane %v687_v22, 6  ;;  %v695_v27 = vrot.slane %v688_v52, 5 }
  0xf8   : > { %v697_v7 = vsel %vm696_vm0, %v685_v4, %v693_v31  ;;  %v699_v53 = vsel %vm698_vm1, %v694_v41, %v695_v27 }
  0xf9   : > { %v701_v8 = vsel %vm700_vm2, %v697_v7, %v699_v53 }
  0xfa   : > { %707 = vst.msk [vmem:[%s137_s8] sm:$0xf] %vm705_vm3, %v701_v8 }
  0xfb   : > { %908 = shalt.err (!%p905_p3)
}
  0xfc   : > { %797 = dma.vmem_to_hbm [thread:$0]  (%p1013_p5), %s722_s13, 64, %s724_s14, %s709_s16  }
  0xfd PF: > { %p803_p4 = scmp.ge.s32.totalorder %s943_s12, 2  ;;  %s735_s27 = sand.u32 1, %s931_s9  }
  0xfe   : > { %s736_s28 = scalar_lea.sflag [#allocation3], %s735_s27 }
  0xff   : > { %p800_p7 = pnand %p803_p4, %p1017_p6 }
 0x101   : > { %p801_p8 = pneg %p800_p7 }
 0x103   : > { %926 = dma.done.wait (%p801_p8), %s736_s28, 64  }
 0x104   : > { %928 = vsyncadd (%p801_p8), %s736_s28, 4294967232  ;;  %p12_p9 = scmp.ge.s32.totalorder %s999_s15, 4   ;;  %s1353_s9 = smov %s935_s10 }
 0x105   : > { %s1354_s10 = smov %s939_s11  ;;  %s1355_s11 = smov %s1011_s18 }
 0x106   : > { %s1356_s12 = smov %s999_s15  ;;  %14 = sbr.rel (!%p12_p9) target bundleno = 3 (0x3), region = 69 }
 0x10b   :  { %742 = vsyncpa [#allocation3], 1 }
 0x10c   :  { %744 = vsyncpa [#allocation3 + $0x1], 1 }

</bundles_post_ra>
